<compile_context>
chip_gen: v7x
topology: tpu7x:2x2x1
jax: 0.10.0
libtpu: 0.0.40
codegen_flags: <defaults>
</compile_context>

<pallas_src>
import jax
import jax.numpy as jnp
from jax import lax
from jax.experimental import pallas as pl
from jax.experimental.pallas import tpu as pltpu

EPS = 1e-05


def bn_relu_kernel(x_ref, gamma_ref, beta_ref, o_ref):
    # x_ref:     (C, R)  channels on sublanes, flattened N*H*W on lanes
    # gamma_ref: (C, 1)
    # beta_ref:  (C, 1)
    x = x_ref[...].astype(jnp.float32)
    r = x.shape[1]
    inv_n = jnp.float32(1.0 / r)

    # Single-pass biased (training-mode) statistics per channel.
    s1 = jnp.sum(x, axis=1, keepdims=True)        # (C, 1)  sum(x)
    s2 = jnp.sum(x * x, axis=1, keepdims=True)    # (C, 1)  sum(x^2)
    mean = s1 * inv_n
    var = jnp.maximum(s2 * inv_n - mean * mean, 0.0)  # guard tiny negatives
    inv_std = lax.rsqrt(var + EPS)

    # Fold affine into a single FMA per element.
    scale = gamma_ref[...] * inv_std              # (C, 1)
    bias = beta_ref[...] - mean * scale           # (C, 1)
    y = x * scale + bias

    # ReLU
    o_ref[...] = jnp.maximum(y, 0.0).astype(o_ref.dtype)


def batchnorm_relu(x_nchw, gamma, beta):
    """x_nchw: (N, C, H, W) float32; gamma, beta: (C,) float32. Returns NCHW."""
    N, C, H, W = x_nchw.shape

    # For N == 1 the NCHW buffer is already (C, H*W)-contiguous: pure reshape,
    # no relayout.  (General N would need a transpose; spec shape has N=1.)
    if N == 1:
        x_cr = x_nchw.reshape(C, H * W)
    else:
        x_cr = jnp.transpose(x_nchw, (1, 0, 2, 3)).reshape(C, N * H * W)
    R = x_cr.shape[1]

    gamma2d = gamma.reshape(C, 1)
    beta2d = beta.reshape(C, 1)

    out_cr = pl.pallas_call(
        bn_relu_kernel,
        out_shape=jax.ShapeDtypeStruct((C, R), x_cr.dtype),
        grid_spec=pltpu.PrefetchScalarGridSpec(
            num_scalar_prefetch=0,
            grid=(1,),
            in_specs=[
                pl.BlockSpec((C, R), lambda i: (0, 0)),   # full-array block
                pl.BlockSpec((C, 1), lambda i: (0, 0)),
                pl.BlockSpec((C, 1), lambda i: (0, 0)),
            ],
            out_specs=pl.BlockSpec((C, R), lambda i: (0, 0)),
        ),
        compiler_params=pltpu.CompilerParams(
            dimension_semantics=("arbitrary",)
        ),
    )(x_cr, gamma2d, beta2d)

    if N == 1:
        return out_cr.reshape(N, C, H, W)
    return jnp.transpose(out_cr.reshape(C, N, H, W), (1, 0, 2, 3))


if __name__ == "__main__":
    key = jax.random.PRNGKey(0)
    kx, kg, kb = jax.random.split(key, 3)

    N, C, H, W = 1, 128, 7, 7  # shapes implied by BatchNorm2d(128) and x569
    x = jax.random.normal(kx, (N, C, H, W), dtype=jnp.float32)
    # Deterministic, non-trivial affine params (PyTorch default would be ones/zeros).
    gamma = 1.0 + 0.1 * jax.random.normal(kg, (C,), dtype=jnp.float32)
    beta = 0.1 * jax.random.normal(kb, (C,), dtype=jnp.float32)

    out = batchnorm_relu(x, gamma, beta)
    out = jax.block_until_ready(out)

    # Pure-JAX reference (training-mode batchnorm + relu).
    mean = jnp.mean(x, axis=(0, 2, 3), keepdims=True)
    var = jnp.mean((x - mean) ** 2, axis=(0, 2, 3), keepdims=True)
    ref = (x - mean) / jnp.sqrt(var + EPS)
    ref = ref * gamma.reshape(1, C, 1, 1) + beta.reshape(1, C, 1, 1)
    ref = jnp.maximum(ref, 0.0)
    assert out.shape == (N, C, H, W)
    assert jnp.allclose(out, ref, atol=1e-5, rtol=1e-5)

    print("KERNEL_OK")
</pallas_src>

<mosaic_0001>
module attributes {stable_mosaic.version = 11 : i64} {
  func.func @bn_relu_kernel(%arg0: i32, %arg1: memref<128x49xf32, #tpu.memory_space<vmem>>, %arg2: memref<128x1xf32, #tpu.memory_space<vmem>>, %arg3: memref<128x1xf32, #tpu.memory_space<vmem>>, %arg4: memref<128x49xf32, #tpu.memory_space<vmem>>) attributes {dimension_semantics = [#tpu.dimension_semantics<arbitrary>], iteration_bounds = array<i64: 1>, scalar_prefetch = 0 : i64, scratch_operands = 0 : i64, tpu.core_type = #tpu.core_type<tc>, window_params = [{pipeline_mode = #tpu.pipeline_mode<synchronous>, transform_indices = @transform_0, window_bounds = array<i64: 128, 49>}, {pipeline_mode = #tpu.pipeline_mode<synchronous>, transform_indices = @transform_1, window_bounds = array<i64: 128, 1>}, {pipeline_mode = #tpu.pipeline_mode<synchronous>, transform_indices = @transform_2, window_bounds = array<i64: 128, 1>}, {pipeline_mode = #tpu.pipeline_mode<synchronous>, transform_indices = @transform_3, window_bounds = array<i64: 128, 49>}]} {
    %c0 = arith.constant 0 : index
    %c0_0 = arith.constant 0 : index
    %0 = vector.load %arg1[%c0, %c0_0] : memref<128x49xf32, #tpu.memory_space<vmem>>, vector<128x49xf32>
    %cst = arith.constant dense<0.000000e+00> : vector<128xf32>
    %1 = vector.multi_reduction <add>, %0, %cst [1] : vector<128x49xf32> to vector<128xf32>
    %2 = vector.shape_cast %1 : vector<128xf32> to vector<128x1xf32>
    %3 = arith.mulf %0, %0 : vector<128x49xf32>
    %cst_1 = arith.constant dense<0.000000e+00> : vector<128xf32>
    %4 = vector.multi_reduction <add>, %3, %cst_1 [1] : vector<128x49xf32> to vector<128xf32>
    %5 = vector.shape_cast %4 : vector<128xf32> to vector<128x1xf32>
    %cst_2 = arith.constant 0.0204081628 : f32
    %6 = vector.broadcast %cst_2 : f32 to vector<128x1xf32>
    %7 = arith.mulf %2, %6 : vector<128x1xf32>
    %cst_3 = arith.constant 0.0204081628 : f32
    %8 = vector.broadcast %cst_3 : f32 to vector<128x1xf32>
    %9 = arith.mulf %5, %8 : vector<128x1xf32>
    %10 = arith.mulf %7, %7 : vector<128x1xf32>
    %11 = arith.subf %9, %10 : vector<128x1xf32>
    %cst_4 = arith.constant 0.000000e+00 : f32
    %12 = vector.broadcast %cst_4 : f32 to vector<128x1xf32>
    %13 = arith.maximumf %11, %12 : vector<128x1xf32>
    %cst_5 = arith.constant 9.99999974E-6 : f32
    %14 = vector.broadcast %cst_5 : f32 to vector<128x1xf32>
    %15 = arith.addf %13, %14 : vector<128x1xf32>
    %16 = math.rsqrt %15 : vector<128x1xf32>
    %c0_6 = arith.constant 0 : index
    %c0_7 = arith.constant 0 : index
    %17 = vector.load %arg2[%c0_6, %c0_7] : memref<128x1xf32, #tpu.memory_space<vmem>>, vector<128x1xf32>
    %18 = arith.mulf %17, %16 : vector<128x1xf32>
    %c0_8 = arith.constant 0 : index
    %c0_9 = arith.constant 0 : index
    %19 = vector.load %arg3[%c0_8, %c0_9] : memref<128x1xf32, #tpu.memory_space<vmem>>, vector<128x1xf32>
    %20 = arith.mulf %7, %18 : vector<128x1xf32>
    %21 = arith.subf %19, %20 : vector<128x1xf32>
    %22 = vector.broadcast %18 : vector<128x1xf32> to vector<128x49xf32>
    %23 = arith.mulf %0, %22 : vector<128x49xf32>
    %24 = vector.broadcast %21 : vector<128x1xf32> to vector<128x49xf32>
    %25 = arith.addf %23, %24 : vector<128x49xf32>
    %cst_10 = arith.constant 0.000000e+00 : f32
    %26 = vector.broadcast %cst_10 : f32 to vector<128x49xf32>
    %27 = arith.maximumf %25, %26 : vector<128x49xf32>
    %c0_11 = arith.constant 0 : index
    %c0_12 = arith.constant 0 : index
    %28 = vector.load %arg4[%c0_11, %c0_12] : memref<128x49xf32, #tpu.memory_space<vmem>>, vector<128x49xf32>
    tpu.vector_store %arg4[%c0_11, %c0_12], %27 {strides = array<i32>} : memref<128x49xf32, #tpu.memory_space<vmem>>, vector<128x49xf32>,
    return
  }
  func.func @transform_0(%arg0: i32) -> (i32, i32) {
    %c0_i32 = arith.constant 0 : i32
    %c0_i32_0 = arith.constant 0 : i32
    %c0_i32_1 = arith.constant 0 : i32
    return %c0_i32, %c0_i32_0 : i32, i32
  }
  func.func @transform_1(%arg0: i32) -> (i32, i32) {
    %c0_i32 = arith.constant 0 : i32
    %c0_i32_0 = arith.constant 0 : i32
    %c0_i32_1 = arith.constant 0 : i32
    return %c0_i32, %c0_i32_0 : i32, i32
  }
  func.func @transform_2(%arg0: i32) -> (i32, i32) {
    %c0_i32 = arith.constant 0 : i32
    %c0_i32_0 = arith.constant 0 : i32
    %c0_i32_1 = arith.constant 0 : i32
    return %c0_i32, %c0_i32_0 : i32, i32
  }
  func.func @transform_3(%arg0: i32) -> (i32, i32) {
    %c0_i32 = arith.constant 0 : i32
    %c0_i32_0 = arith.constant 0 : i32
    %c0_i32_1 = arith.constant 0 : i32
    return %c0_i32, %c0_i32_0 : i32, i32
  }
}

</mosaic_0001>

<bundles_post_ra>
// kernel: tpu_custom_call.1
= control target key start
LH: loop header
LB: loop body
LE: loop exit
PB: predicated region body
PF: predicated region fallthrough
CT: control target
= control target key end

     0   :  { %vm30_vm0 = vcmask 400384   ;;  %s1088_s0 = inlined_call_operand.vmem [shape: f32[128,49], index: 0, kind: input, shape index: {}]   ;;  %s1089_s1 = inlined_call_operand.vmem [shape: f32[128,1], index: 1, kind: input, shape index: {}]   ;;  %s1090_s2 = inlined_call_operand.vmem [shape: f32[128,1], index: 2, kind: input, shape index: {}]   ;;  %s1091_s3 = inlined_call_operand.vmem [shape: f32[128,49], index: 3, kind: output, shape index: {}]  }
   0x1   :  { %v622_v0 = vld [vmem:[%s1088_s0 + $0x10] sm:$0xff]  ;;  %v627_v1 = vld [vmem:[%s1088_s0] sm:$0xff]  ;;  %v632_v2 = vld [vmem:[%s1088_s0 + $0x18] sm:$0xff] }
   0x2   :  { %v37_v3 = vsel %vm30_vm0, %v622_v0, 0.0  ;;  %v31_v4 = vsel %vm30_vm0, %v627_v1, 0.0  ;;  %v641_v5 = vld [vmem:[%s1088_s0 + $0x8] sm:$0xff]  ;;  %v40_v6 = vsel %vm30_vm0, %v632_v2, 0.0  ;;  %v655_v9 = vld [vmem:[%s1088_s0 + $0x20] sm:$0xff]  ;;  %v664_v12 = vld [vmem:[%s1088_s0 + $0x38] sm:$0xff]  ;;  %v79_v33 = vmul.f32 %v627_v1, %v627_v1 }
   0x3   :  { %38 = vadd.xlane.f32.xlu1 %v37_v3  ;;  %32 = vadd.xlane.f32.xlu0 %v31_v4  ;;  %v34_v7 = vsel %vm30_vm0, %v641_v5, 0.0  ;;  %v650_v8 = vld [vmem:[%s1088_s0 + $0x28] sm:$0xff]  ;;  %v43_v11 = vsel %vm30_vm0, %v655_v9, 0.0  ;;  %v669_v13 = vld [vmem:[%s1088_s0 + $0x30] sm:$0xff]  ;;  %v52_v14 = vsel %vm30_vm0, %v664_v12, 0.0  ;;  %v683_v17 = vld [vmem:[%s1088_s0 + $0x40] sm:$0xff]  ;;  %v80_v32 = vmul.f32 %v641_v5, %v641_v5 }
   0x4   :  { %v46_v10 = vsel %vm30_vm0, %v650_v8, 0.0  ;;  %v49_v15 = vsel %vm30_vm0, %v669_v13, 0.0  ;;  %v678_v16 = vld [vmem:[%s1088_s0 + $0x48] sm:$0xff]  ;;  %v55_v19 = vsel %vm30_vm0, %v683_v17, 0.0  ;;  %v692_v20 = vld [vmem:[%s1088_s0 + $0x58] sm:$0xff]  ;;  %v697_v21 = vld [vmem:[%s1088_s0 + $0x50] sm:$0xff]  ;;  %v82_v36 = vmul.f32 %v632_v2, %v632_v2 }
   0x5   :  { %v58_v18 = vsel %vm30_vm0, %v678_v16, 0.0  ;;  %v64_v22 = vsel %vm30_vm0, %v692_v20, 0.0  ;;  %v61_v23 = vsel %vm30_vm0, %v697_v21, 0.0  ;;  %v706_v24 = vld [vmem:[%s1088_s0 + $0x68] sm:$0xff]  ;;  %v711_v25 = vld [vmem:[%s1088_s0 + $0x60] sm:$0xff]  ;;  %v720_v28 = vld [vmem:[%s1088_s0 + $0x78] sm:$0xff]  ;;  %v81_v37 = vmul.f32 %v622_v0, %v622_v0 }
   0x6   :  { %v70_v26 = vsel %vm30_vm0, %v706_v24, 0.0  ;;  %v67_v27 = vsel %vm30_vm0, %v711_v25, 0.0  ;;  %v725_v29 = vld [vmem:[%s1088_s0 + $0x70] sm:$0xff]  ;;  %v76_v30 = vsel %vm30_vm0, %v720_v28, 0.0  ;;  %v98_v34 = vsel %vm30_vm0, %v80_v32, 0.0 }
   0x7   :  { %41 = vadd.xlane.f32.xlu1 %v40_v6  ;;  %35 = vadd.xlane.f32.xlu0 %v34_v7  ;;  %v73_v31 = vsel %vm30_vm0, %v725_v29, 0.0  ;;  %v95_v35 = vsel %vm30_vm0, %v79_v33, 0.0  ;;  %v104_v38 = vsel %vm30_vm0, %v82_v36, 0.0  ;;  %v101_v39 = vsel %vm30_vm0, %v81_v37, 0.0 }
   0x8   :  { %v84_v40 = vmul.f32 %v650_v8, %v650_v8  ;;  %v83_v41 = vmul.f32 %v655_v9, %v655_v9  ;;  %v86_v44 = vmul.f32 %v664_v12, %v664_v12  ;;  %v85_v45 = vmul.f32 %v669_v13, %v669_v13 }
   0x9   :  { %v88_v48 = vmul.f32 %v678_v16, %v678_v16  ;;  %v87_v49 = vmul.f32 %v683_v17, %v683_v17  ;;  %v90_v52 = vmul.f32 %v692_v20, %v692_v20  ;;  %v89_v53 = vmul.f32 %v697_v21, %v697_v21 }
   0xa   :  { %v110_v42 = vsel %vm30_vm0, %v84_v40, 0.0  ;;  %v107_v43 = vsel %vm30_vm0, %v83_v41, 0.0  ;;  %v116_v46 = vsel %vm30_vm0, %v86_v44, 0.0  ;;  %v113_v47 = vsel %vm30_vm0, %v85_v45, 0.0 }
   0xb   :  { %47 = vadd.xlane.f32.xlu1 %v46_v10  ;;  %44 = vadd.xlane.f32.xlu0 %v43_v11  ;;  %v122_v50 = vsel %vm30_vm0, %v88_v48, 0.0  ;;  %v119_v51 = vsel %vm30_vm0, %v87_v49, 0.0  ;;  %v128_v54 = vsel %vm30_vm0, %v90_v52, 0.0  ;;  %v125_v55 = vsel %vm30_vm0, %v89_v53, 0.0 }
   0xc   :  { %v92_v56 = vmul.f32 %v706_v24, %v706_v24  ;;  %v91_v57 = vmul.f32 %v711_v25, %v711_v25  ;;  %v94_v60 = vmul.f32 %v720_v28, %v720_v28  ;;  %v93_v61 = vmul.f32 %v725_v29, %v725_v29 }
   0xd   :  { %v598_v3 = vmov 0  }
   0xe   :  { %v134_v58 = vsel %vm30_vm0, %v92_v56, 0.0  ;;  %v131_v59 = vsel %vm30_vm0, %v91_v57, 0.0  ;;  %v140_v62 = vsel %vm30_vm0, %v94_v60, 0.0  ;;  %v137_v63 = vsel %vm30_vm0, %v93_v61, 0.0  ;;  %565 = vset.pattern.permute.xlu1 %v598_v3  ;;  %564 = vset.pattern.permute.xlu0 %v598_v3 }
   0xf   :  { %53 = vadd.xlane.f32.xlu1 %v52_v14  ;;  %50 = vadd.xlane.f32.xlu0 %v49_v15 }
  0x13   :  { %59 = vadd.xlane.f32.xlu1 %v58_v18  ;;  %56 = vadd.xlane.f32.xlu0 %v55_v19 }
  0x17   :  { %65 = vadd.xlane.f32.xlu1 %v64_v22  ;;  %62 = vadd.xlane.f32.xlu0 %v61_v23 }
  0x1b   :  { %71 = vadd.xlane.f32.xlu1 %v70_v26  ;;  %68 = vadd.xlane.f32.xlu0 %v67_v27 }
  0x1f   :  { %77 = vadd.xlane.f32.xlu1 %v76_v30  ;;  %74 = vadd.xlane.f32.xlu0 %v73_v31 }
  0x23   :  { %99 = vadd.xlane.f32.xlu1 %v98_v34  ;;  %96 = vadd.xlane.f32.xlu0 %v95_v35 }
  0x27   :  { %105 = vadd.xlane.f32.xlu1 %v104_v38  ;;  %102 = vadd.xlane.f32.xlu0 %v101_v39 }
  0x2b   :  { %111 = vadd.xlane.f32.xlu1 %v110_v42  ;;  %108 = vadd.xlane.f32.xlu0 %v107_v43 }
  0x2f   :  { %117 = vadd.xlane.f32.xlu1 %v116_v46  ;;  %114 = vadd.xlane.f32.xlu0 %v113_v47 }
  0x33   :  { %123 = vadd.xlane.f32.xlu1 %v122_v50  ;;  %120 = vadd.xlane.f32.xlu0 %v119_v51 }
  0x37   :  { %129 = vadd.xlane.f32.xlu1 %v128_v54  ;;  %126 = vadd.xlane.f32.xlu0 %v125_v55 }
  0x3b   :  { %135 = vadd.xlane.f32.xlu1 %v134_v58  ;;  %132 = vadd.xlane.f32.xlu0 %v131_v59 }
  0x3f   :  { %141 = vadd.xlane.f32.xlu1 %v140_v62  ;;  %138 = vadd.xlane.f32.xlu0 %v137_v63 }
  0x90   :  { %v39_v4 = vpop.xlane.xlu1 %38  ;;  %v33_v6 = vpop.xlane.xlu0 %32 }
  0x91   :  { %v791_v33 = vmul.f32 0.020408163, %v33_v6  ;;  %v795_v35 = vmul.f32 0.020408163, %v39_v4 }
  0x93   :  { %v175_v39 = vmul.f32 %v791_v33, %v791_v33  ;;  %v177_v45 = vmul.f32 %v795_v35, %v795_v35 }
  0x94   :  { %v42_v7 = vpop.xlane.xlu1 %41  ;;  %v36_v10 = vpop.xlane.xlu0 %35 }
  0x95   :  { %v793_v34 = vmul.f32 0.020408163, %v36_v10  ;;  %v797_v36 = vmul.f32 0.020408163, %v42_v7 }
  0x97   :  { %v176_v40 = vmul.f32 %v793_v34, %v793_v34  ;;  %v178_v46 = vmul.f32 %v797_v36, %v797_v36 }
  0x98   :  { %v48_v11 = vpop.xlane.xlu1 %47  ;;  %v45_v14 = vpop.xlane.xlu0 %44 }
  0x99   :  { %v807_v47 = vmul.f32 0.020408163, %v48_v11  ;;  %v809_v54 = vmul.f32 0.020408163, %v45_v14 }
  0x9b   :  { %v180_v59 = vmul.f32 %v807_v47, %v807_v47  ;;  %v179_v4 = vmul.f32 %v809_v54, %v809_v54 }
  0x9c   :  { %v54_v15 = vpop.xlane.xlu1 %53  ;;  %v51_v18 = vpop.xlane.xlu0 %50 }
  0x9d   :  { %v815_v6 = vmul.f32 0.020408163, %v51_v18 }
  0xa0   :  { %v60_v19 = vpop.xlane.xlu1 %59  ;;  %v779_v22 = vpop.xlane.xlu0 %56 }
  0xa4   :  { %v66_v23 = vpop.xlane.xlu1 %65  ;;  %v781_v26 = vpop.xlane.xlu0 %62 }
  0xa5   :  { %v823_v18 = vmul.f32 0.020408163, %v66_v23  ;;  %v833_v23 = vmul.f32 0.020408163, %v779_v22 }
  0xa8   :  { %v783_v27 = vpop.xlane.xlu1 %71  ;;  %v785_v30 = vpop.xlane.xlu0 %68 }
  0xa9   :  { %v843_v22 = vmul.f32 0.020408163, %v783_v27 }
  0xac   :  { %v787_v31 = vpop.xlane.xlu1 %77  ;;  %v789_v32 = vpop.xlane.xlu0 %74 }
  0xb0   :  { %v100_v37 = vpop.xlane.xlu1 %99  ;;  %v97_v38 = vpop.xlane.xlu0 %96 }
  0xb1   :  { %v160_v41 = vmul.f32 0.020408163, %v100_v37  ;;  %v159_v42 = vmul.f32 0.020408163, %v97_v38 }
  0xb3   :  { %v192_v43 = vsub.f32 %v160_v41, %v176_v40  ;;  %v191_v44 = vsub.f32 %v159_v42, %v175_v39  ;;  %v817_v39 = vmul.f32 0.020408163, %v60_v19  ;;  %v819_v42 = vmul.f32 0.020408163, %v54_v15  ;;  %v256_v15 = vld [vmem:[%s1089_s1 + $0x8] sm:$0xff] }
  0xb4   :  { %v106_v48 = vpop.xlane.xlu1 %105  ;;  %v103_v49 = vpop.xlane.xlu0 %102 }
  0xb5   :  { %v208_v50 = vmax.f32 %v192_v43, 0.0  ;;  %v207_v51 = vmax.f32 %v191_v44, 0.0  ;;  %v162_v52 = vmul.f32 0.020408163, %v106_v48  ;;  %v161_v53 = vmul.f32 0.020408163, %v103_v49 }
  0xb6   :  { %v181_v43 = vmul.f32 %v815_v6, %v815_v6  ;;  %v184_v19 = vmul.f32 %v817_v39, %v817_v39 }
  0xb7   :  { %v224_v55 = vadd.f32 1e-05, %v208_v50  ;;  %v223_v56 = vadd.f32 1e-05, %v207_v51  ;;  %v194_v57 = vsub.f32 %v162_v52, %v178_v46  ;;  %v193_v58 = vsub.f32 %v161_v53, %v177_v45 }
  0xb8   :  { %v112_v60 = vpop.xlane.xlu1 %111  ;;  %v109_v61 = vpop.xlane.xlu0 %108  ;;  %v182_v53 = vmul.f32 %v819_v42, %v819_v42 }
  0xb9   :  { %566 = vrsqrt.f32 %v224_v55  ;;  %v210_v62 = vmax.f32 %v194_v57, 0.0  ;;  %v209_v63 = vmax.f32 %v193_v58, 0.0  ;;  %v164_v3 = vmul.f32 0.020408163, %v112_v60 }
  0xba   :  { %568 = vrsqrt.f32 %v223_v56  ;;  %v163_v7 = vmul.f32 0.020408163, %v109_v61  ;;  %v186_v56 = vmul.f32 %v823_v18, %v823_v18 }
  0xbb   :  { %v225_v10 = vadd.f32 1e-05, %v209_v63  ;;  %v196_v11 = vsub.f32 %v164_v3, %v180_v59  ;;  %v226_v40 = vadd.f32 1e-05, %v210_v62  ;;  %v255_v59 = vld [vmem:[%s1089_s1] sm:$0xff] }
  0xbc   :  { %v195_v14 = vsub.f32 %v163_v7, %v179_v4  ;;  %v118_v37 = vpop.xlane.xlu1 %117  ;;  %v115_v38 = vpop.xlane.xlu0 %114 }
  0xbd   :  { %v165_v41 = vmul.f32 0.020408163, %v115_v38  ;;  %570 = vrsqrt.f32 %v225_v10  ;;  %v212_v45 = vmax.f32 %v196_v11, 0.0  ;;  %v166_v46 = vmul.f32 0.020408163, %v118_v37 }
  0xbe   :  { %v211_v44 = vmax.f32 %v195_v14, 0.0  ;;  %572 = vrsqrt.f32 %v226_v40  ;;  %v183_v14 = vmul.f32 %v833_v23, %v833_v23  ;;  %v848_v37 = vmul.f32 0.020408163, %v781_v26 }
  0xbf   :  { %v197_v48 = vsub.f32 %v165_v41, %v181_v43  ;;  %v228_v57 = vadd.f32 1e-05, %v212_v45  ;;  %v198_v61 = vsub.f32 %v166_v46, %v182_v53  ;;  %v854_v40 = vmul.f32 0.020408163, %v787_v31  ;;  %v257_v43 = vld [vmem:[%s1089_s1 + $0x10] sm:$0xff] }
  0xc0   :  { %v124_v49 = vpop.xlane.xlu1 %123  ;;  %v121_v50 = vpop.xlane.xlu0 %120  ;;  %v227_v51 = vadd.f32 1e-05, %v211_v44  ;;  %v188_v31 = vmul.f32 %v843_v22, %v843_v22 }
  0xc1   :  { %v168_v52 = vmul.f32 0.020408163, %v124_v49  ;;  %v213_v62 = vmax.f32 %v197_v48, 0.0  ;;  %v167_v63 = vmul.f32 0.020408163, %v121_v50  ;;  %v214_v45 = vmax.f32 %v198_v61, 0.0 }
  0xc2   :  { %574 = vrsqrt.f32 %v227_v51 }
  0xc3   :  { %v567_v55 = vpop.eup %566  ;;  %v200_v58 = vsub.f32 %v168_v52, %v184_v19  ;;  %576 = vrsqrt.f32 %v228_v57  ;;  %v229_v46 = vadd.f32 1e-05, %v213_v62  ;;  %v199_v48 = vsub.f32 %v167_v63, %v183_v14 }
  0xc4   :  { %v569_v60 = vpop.eup %568  ;;  %v130_v3 = vpop.xlane.xlu1 %129  ;;  %v840_v7 = vmul.f32 %v567_v55, %v256_v15  ;;  %v185_v52 = vmul.f32 %v848_v37, %v848_v37  ;;  %v867_v55 = vmul.f32 0.020408163, %v785_v30 }
  0xc5   :  { %v127_v4 = vpop.xlane.xlu0 %126  ;;  %v216_v10 = vmax.f32 %v200_v58, 0.0  ;;  %v170_v11 = vmul.f32 0.020408163, %v130_v3  ;;  %v851_v38 = vmul.f32 %v569_v60, %v255_v59  ;;  %v258_v59 = vld [vmem:[%s1089_s1 + $0x18] sm:$0xff]  ;;  %v230_v60 = vadd.f32 1e-05, %v214_v45 }
  0xc6   :  { %342 = vperm.xlu1 %565, %v840_v7   ;;  %v169_v26 = vmul.f32 0.020408163, %v127_v4  ;;  %v215_v61 = vmax.f32 %v199_v48, 0.0  ;;  %v259_v45 = vld [vmem:[%s1089_s1 + $0x20] sm:$0xff] }
  0xc7   :  { %v232_v41 = vadd.f32 1e-05, %v216_v10  ;;  %v202_v27 = vsub.f32 %v170_v11, %v186_v56  ;;  %v571_v44 = vpop.eup %570  ;;  %337 = vperm.xlu0 %564, %v851_v38   ;;  %v190_v56 = vmul.f32 %v854_v40, %v854_v40 }
  0xc8   :  { %v136_v49 = vpop.xlane.xlu1 %135  ;;  %v864_v15 = vmul.f32 %v571_v44, %v257_v43  ;;  %v573_v53 = vpop.eup %572  ;;  %v201_v62 = vsub.f32 %v169_v26, %v185_v52 }
  0xc9   :  { %v133_v50 = vpop.xlane.xlu0 %132  ;;  %578 = vrsqrt.f32 %v232_v41  ;;  %v218_v19 = vmax.f32 %v202_v27, 0.0  ;;  %v172_v51 = vmul.f32 0.020408163, %v136_v49  ;;  %v875_v11 = vmul.f32 %v573_v53, %v258_v59 }
  0xca   :  { %580 = vrsqrt.f32 %v229_v46  ;;  %347 = vperm.xlu1 %565, %v864_v15   ;;  %v171_v30 = vmul.f32 0.020408163, %v133_v50  ;;  %v187_v41 = vmul.f32 %v867_v55, %v867_v55  ;;  %v880_v27 = vmul.f32 0.020408163, %v789_v32  ;;  %v264_v32 = vld [vmem:[%s1089_s1 + $0x48] sm:$0xff] }
  0xcb   :  { %v234_v57 = vadd.f32 1e-05, %v218_v19  ;;  %v204_v58 = vsub.f32 %v172_v51, %v188_v31  ;;  %v231_v46 = vadd.f32 1e-05, %v215_v61  ;;  %v217_v48 = vmax.f32 %v201_v62, 0.0  ;;  %v266_v61 = vld [vmem:[%s1089_s1 + $0x58] sm:$0xff] }
  0xcc   :  { %v142_v63 = vpop.xlane.xlu1 %141  ;;  %v575_v14 = vpop.eup %574  ;;  %v203_v49 = vsub.f32 %v171_v30, %v187_v41  ;;  %v189_v52 = vmul.f32 %v880_v27, %v880_v27  ;;  %v261_v30 = vld [vmem:[%s1089_s1 + $0x30] sm:$0xff]  ;;  %v268_v41 = vld [vmem:[%s1089_s1 + $0x68] sm:$0xff] }
  0xcd   :  { %582 = vrsqrt.f32 %v234_v57  ;;  %v220_v3 = vmax.f32 %v204_v58, 0.0  ;;  %v174_v4 = vmul.f32 0.020408163, %v142_v63  ;;  %v139_v10 = vpop.xlane.xlu0 %138  ;;  %v577_v26 = vpop.eup %576  ;;  %v889_v19 = vmul.f32 %v575_v14, %v259_v45 }
  0xce   :  { %584 = vrsqrt.f32 %v230_v60  ;;  %352 = vperm.xlu1 %565, %v875_v11   ;;  %v173_v31 = vmul.f32 0.020408163, %v139_v10  ;;  %v233_v58 = vadd.f32 1e-05, %v217_v48  ;;  %v219_v59 = vmax.f32 %v203_v49, 0.0  ;;  %v270_v49 = vld [vmem:[%s1089_s1 + $0x78] sm:$0xff] }
  0xcf   :  { %v236_v43 = vadd.f32 1e-05, %v220_v3  ;;  %v206_v44 = vsub.f32 %v174_v4, %v190_v56  ;;  %v260_v56 = vld [vmem:[%s1089_s1 + $0x28] sm:$0xff] }
  0xd0   :  { %v205_v60 = vsub.f32 %v173_v31, %v189_v52  ;;  %v276_v63 = vmul.f32 %v577_v26, %v260_v56  ;;  %v235_v10 = vadd.f32 1e-05, %v219_v59  ;;  %v288_v56 = vld [vmem:[%s1090_s2 + $0x8] sm:$0xff] }
  0xd1   :  { %586 = vrsqrt.f32 %v236_v43  ;;  %v222_v50 = vmax.f32 %v206_v44, 0.0 }
  0xd2   :  { %588 = vrsqrt.f32 %v231_v46  ;;  %357 = vperm.xlu1 %565, %v889_v19   ;;  %v221_v14 = vmax.f32 %v205_v60, 0.0  ;;  %v262_v46 = vld [vmem:[%s1089_s1 + $0x38] sm:$0xff]  ;;  %v265_v60 = vld [vmem:[%s1089_s1 + $0x50] sm:$0xff] }
  0xd3   :  { %v579_v51 = vpop.eup %578  ;;  %v238_v53 = vadd.f32 1e-05, %v222_v50 }
  0xd4   :  { %v897_v57 = vmul.f32 %v579_v51, %v264_v32  ;;  %v581_v62 = vpop.eup %580  ;;  %v237_v26 = vadd.f32 1e-05, %v221_v14  ;;  %v263_v51 = vld [vmem:[%s1089_s1 + $0x40] sm:$0xff]  ;;  %v308_v14 = vmul.f32 %v276_v63, %v807_v47 }
  0xd5   :  { %590 = vrsqrt.f32 %v238_v53  ;;  %v912_v44 = vmul.f32 %v581_v62, %v261_v30  ;;  %v304_v53 = vmul.f32 %v840_v7, %v793_v34  ;;  %v306_v62 = vmul.f32 %v875_v11, %v797_v36  ;;  %v290_v34 = vld [vmem:[%s1090_s2 + $0x18] sm:$0xff]  ;;  %v267_v30 = vld [vmem:[%s1089_s1 + $0x60] sm:$0xff] }
  0xd6   :  { %382 = vperm.xlu0 %564, %v897_v57   ;;  %362 = vperm.xlu1 %565, %v276_v63   ;;  %592 = vrsqrt.f32 %v233_v58  ;;  %v303_v63 = vmul.f32 %v851_v38, %v791_v33  ;;  %v289_v33 = vld [vmem:[%s1090_s2 + $0x10] sm:$0xff] }
  0xd7   :  { %v583_v3 = vpop.eup %582  ;;  %594 = vrsqrt.f32 %v235_v10  ;;  %v322_v10 = vsub.f32 %v290_v34, %v306_v62 }
  0xd8   :  { %v906_v4 = vmul.f32 %v583_v3, %v266_v61  ;;  %v585_v43 = vpop.eup %584  ;;  %596 = vrsqrt.f32 %v237_v26  ;;  %v320_v61 = vsub.f32 %v288_v56, %v304_v53  ;;  %v294_v26 = vld [vmem:[%s1090_s2 + $0x38] sm:$0xff]  ;;  %v307_v56 = vmul.f32 %v889_v19, %v809_v54  ;;  %v293_v54 = vld [vmem:[%s1090_s2 + $0x30] sm:$0xff] }
  0xd9   :  { %v278_v31 = vmul.f32 %v585_v43, %v262_v46  ;;  %v269_v43 = vld [vmem:[%s1089_s1 + $0x70] sm:$0xff] }
  0xda   :  { %392 = vperm.xlu0 %564, %v906_v4   ;;  %367 = vperm.xlu1 %565, %v912_v44   ;;  %v314_v53 = vmul.f32 %v906_v4, %v823_v18  ;;  %v300_v18 = vld [vmem:[%s1090_s2 + $0x68] sm:$0xff] }
  0xdb   :  { %v587_v45 = vpop.eup %586  ;;  %v310_v46 = vmul.f32 %v278_v31, %v819_v42  ;;  %v296_v42 = vld [vmem:[%s1090_s2 + $0x48] sm:$0xff] }
  0xdc   :  { %v284_v48 = vmul.f32 %v587_v45, %v268_v41  ;;  %v589_v50 = vpop.eup %588  ;;  %v292_v41 = vld [vmem:[%s1090_s2 + $0x28] sm:$0xff] }
  0xdd   :  { %v279_v58 = vmul.f32 %v589_v50, %v263_v51  ;;  %v324_v45 = vsub.f32 %v292_v41, %v308_v14  ;;  %v326_v50 = vsub.f32 %v294_v26, %v310_v46  ;;  %v305_v51 = vmul.f32 %v864_v15, %v795_v35  ;;  %v291_v35 = vld [vmem:[%s1090_s2 + $0x20] sm:$0xff] }
  0xde   :  { %402 = vperm.xlu0 %564, %v284_v48   ;;  %372 = vperm.xlu1 %565, %v278_v31   ;;  %v323_v4 = vsub.f32 %v291_v35, %v307_v56 }
  0xdf   :  { %v591_v32 = vpop.eup %590  ;;  %v311_v62 = vmul.f32 %v279_v58, %v833_v23  ;;  %v299_v23 = vld [vmem:[%s1090_s2 + $0x60] sm:$0xff] }
  0xe0   :  { %v286_v52 = vmul.f32 %v591_v32, %v270_v49  ;;  %v593_v59 = vpop.eup %592  ;;  %v287_v49 = vld [vmem:[%s1090_s2] sm:$0xff]  ;;  %v312_v32 = vmul.f32 %v897_v57, %v817_v39  ;;  %v298_v39 = vld [vmem:[%s1090_s2 + $0x58] sm:$0xff]  ;;  %v321_v57 = vsub.f32 %v289_v33, %v305_v51 }
  0xe1   :  { %v281_v7 = vmul.f32 %v593_v59, %v265_v60  ;;  %v595_v3 = vpop.eup %594  ;;  %v319_v31 = vsub.f32 %v287_v49, %v303_v63  ;;  %v330_v15 = vsub.f32 %v298_v39, %v314_v53  ;;  %v316_v59 = vmul.f32 %v284_v48, %v843_v22  ;;  %v302_v22 = vld [vmem:[%s1090_s2 + $0x78] sm:$0xff] }
  0xe2   :  { %412 = vperm.xlu0 %564, %v286_v52   ;;  %377 = vperm.xlu1 %565, %v279_v58   ;;  %v283_v36 = vmul.f32 %v595_v3, %v267_v30  ;;  %v597_v11 = vpop.eup %596  ;;  %v328_v38 = vsub.f32 %v296_v42, %v312_v32  ;;  %v309_v60 = vmul.f32 %v912_v44, %v815_v6  ;;  %v295_v6 = vld [vmem:[%s1090_s2 + $0x40] sm:$0xff] }
  0xe3   :  { %v285_v47 = vmul.f32 %v597_v11, %v269_v43  ;;  %v332_v19 = vsub.f32 %v300_v18, %v316_v59  ;;  %v327_v34 = vsub.f32 %v295_v6, %v311_v62  ;;  %v313_v3 = vmul.f32 %v281_v7, %v848_v37  ;;  %v301_v37 = vld [vmem:[%s1090_s2 + $0x70] sm:$0xff] }
  0xe4   :  { %v325_v48 = vsub.f32 %v293_v54, %v309_v60  ;;  %v315_v30 = vmul.f32 %v283_v36, %v867_v55 }
  0xe6   :  { %438 = vperm.xlu0 %564, %v320_v61   ;;  %387 = vperm.xlu1 %565, %v281_v7   ;;  %v318_v61 = vmul.f32 %v286_v52, %v854_v40  ;;  %v297_v40 = vld [vmem:[%s1090_s2 + $0x50] sm:$0xff]  ;;  %v331_v58 = vsub.f32 %v299_v23, %v315_v30 }
  0xe7   :  { %v329_v52 = vsub.f32 %v297_v40, %v313_v3 }
  0xe8   :  { %v334_v44 = vsub.f32 %v302_v22, %v318_v61 }
  0xea   :  { %448 = vperm.xlu0 %564, %v322_v10   ;;  %397 = vperm.xlu1 %565, %v283_v36   ;;  %v317_v10 = vmul.f32 %v285_v47, %v880_v27 }
  0xec   :  { %v333_v7 = vsub.f32 %v301_v37, %v317_v10 }
  0xee   :  { %458 = vperm.xlu0 %564, %v324_v45   ;;  %407 = vperm.xlu1 %565, %v285_v47  }
  0xf2   :  { %468 = vperm.xlu0 %564, %v326_v50   ;;  %433 = vperm.xlu1 %565, %v319_v31  }
  0xf6   :  { %478 = vperm.xlu0 %564, %v328_v38   ;;  %443 = vperm.xlu1 %565, %v321_v57  }
  0xfa   :  { %488 = vperm.xlu0 %564, %v330_v15   ;;  %453 = vperm.xlu1 %565, %v323_v4  }
  0xfe   :  { %498 = vperm.xlu0 %564, %v332_v19   ;;  %463 = vperm.xlu1 %565, %v325_v48  }
 0x102   :  { %508 = vperm.xlu0 %564, %v334_v44   ;;  %473 = vperm.xlu1 %565, %v327_v34  }
 0x106   :  { %483 = vperm.xlu1 %565, %v329_v52  }
 0x10a   :  { %493 = vperm.xlu1 %565, %v331_v58  }
 0x10e   :  { %503 = vperm.xlu1 %565, %v333_v7  }
 0x145   :  { %v343_v14 = vpop.permute.xlu1 %342 }
 0x146   :  { %v338_v43 = vpop.permute.xlu0 %337  ;;  %v416_v47 = vmul.f32 %v343_v14, %v641_v5 }
 0x147   :  { %v415_v4 = vmul.f32 %v338_v43, %v627_v1 }
 0x149   :  { %v348_v41 = vpop.permute.xlu1 %347 }
 0x14a   :  { %v417_v48 = vmul.f32 %v348_v41, %v622_v0 }
 0x14d   :  { %v353_v11 = vpop.permute.xlu1 %352 }
 0x14e   :  { %v418_v51 = vmul.f32 %v353_v11, %v632_v2 }
 0x151   :  { %v358_v55 = vpop.permute.xlu1 %357 }
 0x152   :  { %v419_v0 = vmul.f32 %v358_v55, %v655_v9 }
 0x155   :  { %v383_v36 = vpop.permute.xlu0 %382  ;;  %v363_v45 = vpop.permute.xlu1 %362 }
 0x156   :  { %v420_v57 = vmul.f32 %v363_v45, %v650_v8  ;;  %v424_v54 = vmul.f32 %v383_v36, %v678_v16 }
 0x159   :  { %v393_v46 = vpop.permute.xlu0 %392  ;;  %v368_v26 = vpop.permute.xlu1 %367 }
 0x15a   :  { %v426_v6 = vmul.f32 %v393_v46, %v692_v20  ;;  %v421_v9 = vmul.f32 %v368_v26, %v669_v13 }
 0x15d   :  { %v403_v63 = vpop.permute.xlu0 %402  ;;  %v373_v49 = vpop.permute.xlu1 %372 }
 0x15e   :  { %v422_v15 = vmul.f32 %v373_v49, %v664_v12  ;;  %v428_v20 = vmul.f32 %v403_v63, %v706_v24 }
 0x161   :  { %v413_v50 = vpop.permute.xlu0 %412  ;;  %v378_v27 = vpop.permute.xlu1 %377 }
 0x162   :  { %v430_v24 = vmul.f32 %v413_v50, %v720_v28  ;;  %v423_v13 = vmul.f32 %v378_v27, %v683_v17 }
 0x165   :  { %v439_v32 = vpop.permute.xlu0 %438  ;;  %v1006_v31 = vpop.permute.xlu1 %387 }
 0x166   :  { %v512_v42 = vadd.f32 %v439_v32, %v416_v47  ;;  %v425_v46 = vmul.f32 %v1006_v31, %v697_v21 }
 0x168   :  { %v528_v33 = vmax.f32 %v512_v42, 0.0 }
 0x169   :  { %v449_v38 = vpop.permute.xlu0 %448  ;;  %v398_v39 = vpop.permute.xlu1 %397 }
 0x16a   :  { %544 = vst.msk [vmem:[%s1091_s3 + $0x8] sm:$0xff] %vm30_vm0, %v528_v33  ;;  %v514_v53 = vadd.f32 %v449_v38, %v418_v51  ;;  %v427_v49 = vmul.f32 %v398_v39, %v711_v25 }
 0x16c   :  { %v530_v56 = vmax.f32 %v514_v53, 0.0 }
 0x16d   :  { %v459_v35 = vpop.permute.xlu0 %458  ;;  %v408_v2 = vpop.permute.xlu1 %407 }
 0x16e   :  { %546 = vst.msk [vmem:[%s1091_s3 + $0x18] sm:$0xff] %vm30_vm0, %v530_v56  ;;  %v516_v5 = vadd.f32 %v459_v35, %v420_v57  ;;  %v429_v47 = vmul.f32 %v408_v2, %v725_v29 }
 0x170   :  { %v532_v59 = vmax.f32 %v516_v5, 0.0 }
 0x171   :  { %v469_v18 = vpop.permute.xlu0 %468  ;;  %v434_v60 = vpop.permute.xlu1 %433 }
 0x172   :  { %548 = vst.msk [vmem:[%s1091_s3 + $0x28] sm:$0xff] %vm30_vm0, %v532_v59  ;;  %v518_v8 = vadd.f32 %v469_v18, %v422_v15  ;;  %v511_v19 = vadd.f32 %v434_v60, %v415_v4 }
 0x174   :  { %v534_v61 = vmax.f32 %v518_v8, 0.0  ;;  %v527_v62 = vmax.f32 %v511_v19, 0.0 }
 0x175   :  { %v479_v22 = vpop.permute.xlu0 %478  ;;  %v444_v12 = vpop.permute.xlu1 %443 }
 0x176   :  { %550 = vst.msk [vmem:[%s1091_s3 + $0x38] sm:$0xff] %vm30_vm0, %v534_v61  ;;  %v520_v1 = vadd.f32 %v479_v22, %v424_v54  ;;  %543 = vst.msk [vmem:[%s1091_s3] sm:$0xff] %vm30_vm0, %v527_v62  ;;  %v513_v16 = vadd.f32 %v444_v12, %v417_v48 }
 0x178   :  { %v536_v44 = vmax.f32 %v520_v1, 0.0  ;;  %v529_v3 = vmax.f32 %v513_v16, 0.0 }
 0x179   :  { %v489_v34 = vpop.permute.xlu0 %488  ;;  %v454_v52 = vpop.permute.xlu1 %453 }
 0x17a   :  { %552 = vst.msk [vmem:[%s1091_s3 + $0x48] sm:$0xff] %vm30_vm0, %v536_v44  ;;  %v522_v40 = vadd.f32 %v489_v34, %v426_v6  ;;  %545 = vst.msk [vmem:[%s1091_s3 + $0x10] sm:$0xff] %vm30_vm0, %v529_v3  ;;  %v515_v30 = vadd.f32 %v454_v52, %v419_v0 }
 0x17c   :  { %v538_v23 = vmax.f32 %v522_v40, 0.0  ;;  %v531_v10 = vmax.f32 %v515_v30, 0.0 }
 0x17d   :  { %v499_v58 = vpop.permute.xlu0 %498  ;;  %v464_v7 = vpop.permute.xlu1 %463 }
 0x17e   :  { %554 = vst.msk [vmem:[%s1091_s3 + $0x58] sm:$0xff] %vm30_vm0, %v538_v23  ;;  %v524_v37 = vadd.f32 %v499_v58, %v428_v20  ;;  %547 = vst.msk [vmem:[%s1091_s3 + $0x20] sm:$0xff] %vm30_vm0, %v531_v10  ;;  %v517_v14 = vadd.f32 %v464_v7, %v421_v9 }
 0x180   :  { %v540_v41 = vmax.f32 %v524_v37, 0.0  ;;  %v533_v43 = vmax.f32 %v517_v14, 0.0 }
 0x181   :  { %v509_v11 = vpop.permute.xlu0 %508  ;;  %v474_v36 = vpop.permute.xlu1 %473 }
 0x182   :  { %556 = vst.msk [vmem:[%s1091_s3 + $0x68] sm:$0xff] %vm30_vm0, %v540_v41  ;;  %v526_v55 = vadd.f32 %v509_v11, %v430_v24  ;;  %549 = vst.msk [vmem:[%s1091_s3 + $0x30] sm:$0xff] %vm30_vm0, %v533_v43  ;;  %v519_v28 = vadd.f32 %v474_v36, %v423_v13 }
 0x184   :  { %v542_v45 = vmax.f32 %v526_v55, 0.0  ;;  %v535_v26 = vmax.f32 %v519_v28, 0.0 }
 0x185   :  { %v484_v17 = vpop.permute.xlu1 %483 }
 0x186   :  { %558 = vst.msk [vmem:[%s1091_s3 + $0x78] sm:$0xff] %vm30_vm0, %v542_v45  ;;  %551 = vst.msk [vmem:[%s1091_s3 + $0x40] sm:$0xff] %vm30_vm0, %v535_v26  ;;  %v521_v63 = vadd.f32 %v484_v17, %v425_v46 }
 0x188   :  { %v537_v50 = vmax.f32 %v521_v63, 0.0 }
 0x189   :  { %v494_v27 = vpop.permute.xlu1 %493 }
 0x18a   :  { %553 = vst.msk [vmem:[%s1091_s3 + $0x50] sm:$0xff] %vm30_vm0, %v537_v50  ;;  %v523_v21 = vadd.f32 %v494_v27, %v427_v49 }
 0x18c   :  { %v539_v32 = vmax.f32 %v523_v21, 0.0 }
 0x18d   :  { %v504_v42 = vpop.permute.xlu1 %503 }
 0x18e   :  { %555 = vst.msk [vmem:[%s1091_s3 + $0x60] sm:$0xff] %vm30_vm0, %v539_v32  ;;  %v525_v31 = vadd.f32 %v504_v42, %v429_v47 }
 0x190   :  { %v541_v51 = vmax.f32 %v525_v31, 0.0 }
 0x192   :  { %557 = vst.msk [vmem:[%s1091_s3 + $0x70] sm:$0xff] %vm30_vm0, %v541_v51 }

</bundles_post_ra>
